<compile_context>
chip_gen: v6e
topology: v6e:2x2x1
jax: 0.10.0
libtpu: 0.0.40
codegen_flags: <defaults>
</compile_context>

<pallas_src>
import functools

import jax
import jax.numpy as jnp
from jax.experimental import pallas as pl
from jax.experimental.pallas import tpu as pltpu

LANE = 128


def _round_up(x, m):
    return ((x + m - 1) // m) * m


@functools.lru_cache(maxsize=None)
def _num_tensorcores():
    """Best-effort TensorCores-per-chip (1 on v5e/v6e, 2 on v7x)."""
    try:
        info = pltpu.get_tpu_info()
    except Exception:
        return 1
    for attr in ("num_cores", "core_count", "num_tensorcores",
                 "tensorcore_count", "cores_per_chip"):
        v = getattr(info, attr, None)
        if isinstance(v, int) and v >= 1:
            return v
    return 1


def _mish_kernel(x_ref, o_ref):
    x = x_ref[...].astype(jnp.float32)
    # mish(x) = x * tanh(softplus(x)); with t = exp(x):
    #   tanh(log1p(t)) = (t^2 + 2t) / (t^2 + 2t + 2)
    # Numerically stable single-exp form with e = exp(-|x|) (never overflows):
    #   x >= 0:  num = 1 + 2e       den = num + 2e^2
    #   x <  0:  num = e^2 + 2e     den = num + 2
    # folded into a single (u, v) select pair.
    e = jnp.exp(-jnp.abs(x))
    pos = x >= 0.0
    u = jnp.where(pos, 1.0, e)
    v = jnp.where(pos, e, 1.0)
    num = u * (u + 2.0 * v)
    den = num + 2.0 * (v * v)
    # den is in [1, 5] -> EUP approximate reciprocal is safe. One
    # Newton-Raphson step brings rel. error to ~1e-7 for f32 outputs; approx
    # alone (~2^-12) already exceeds 16/8-bit output precision.
    r = pl.reciprocal(den, approx=True)
    if o_ref.dtype == jnp.float32:
        r = r * (2.0 - den * r)
    o_ref[...] = (x * num * r).astype(o_ref.dtype)


def _mish_2d(x2d, *, tile_bytes, donate):
    """Mish over a lane-dense (rows, 128) slab."""
    rows, lane = x2d.shape
    assert lane == LANE
    itemsize = jnp.dtype(x2d.dtype).itemsize
    n = rows * lane
    # Sublane granularity: 8 rows per vreg for 32-bit, 16 for 16-bit, 32 for 8-bit.
    min_rows = 8 * max(1, 4 // itemsize)

    # dtype-scaled tile (~tile_bytes regardless of itemsize).
    tr = max(min_rows, (int(tile_bytes) // (LANE * itemsize)) // min_rows * min_rows)
    # Keep >= 2 grid steps only when a second TensorCore can actually consume
    # them (v7x megacore) and the array is large enough to amortize the extra
    # ~0.35 us grid step; on single-core v5e/v6e this split is pure overhead.
    if _num_tensorcores() > 1 and n * itemsize > (1 << 20) and rows > min_rows:
        tr = min(tr, _round_up(pl.cdiv(rows, 2), min_rows))
    tr = min(tr, rows)  # a full-extent block is always legal

    grid = (pl.cdiv(rows, tr),)  # ragged trailing row-block is masked by Pallas
    tile_b = tr * LANE * itemsize
    # Double-buffered in + out tiles + slack; 32 MiB cap fits v7x (64 MiB VMEM/TC).
    vmem_limit = int(min(max(2 * 2 * tile_b + 2 * 2**20, 16 * 2**20), 32 * 2**20))

    return pl.pallas_call(
        _mish_kernel,
        out_shape=jax.ShapeDtypeStruct((rows, LANE), x2d.dtype),
        grid_spec=pltpu.PrefetchScalarGridSpec(
            num_scalar_prefetch=0,
            grid=grid,
            in_specs=[pl.BlockSpec((tr, LANE), lambda i: (i, 0))],
            out_specs=pl.BlockSpec((tr, LANE), lambda i: (i, 0)),
        ),
        compiler_params=pltpu.CompilerParams(
            dimension_semantics=("parallel",),
            vmem_limit_bytes=vmem_limit,
        ),
        cost_estimate=pl.CostEstimate(
            flops=12 * n, transcendentals=n, bytes_accessed=2 * n * itemsize),
        # In-place capable elementwise op: alias in->out only when the caller
        # can donate x (otherwise XLA would insert an extra copy).
        input_output_aliases=({0: 0} if donate else {}),
    )(x2d)


def _mish_tiny(x_flat):
    """Kernel path for arrays smaller than one 128-lane row.

    Pads a handful (<128) of elements to one (1, 128) row; this is a few
    hundred bytes, not a full-array pass (mish(0) == 0, and the pad is
    sliced off anyway).
    """
    n = x_flat.shape[0]
    xp = jnp.pad(x_flat, (0, LANE - n)).reshape(1, LANE)
    out = pl.pallas_call(
        _mish_kernel,
        out_shape=jax.ShapeDtypeStruct((1, LANE), x_flat.dtype),
    )(xp)
    return out.reshape(-1)[:n]


def mish(x, *, tile_bytes=4 * 2**20, donate=False):
    """Elementwise Mish. Accepts any shape (e.g. NCHW); same shape/dtype out."""
    orig_shape = x.shape
    n = x.size
    if n == 0:
        return x

    x_flat = x.reshape(-1)              # free for a contiguous array
    n_main = (n // LANE) * LANE
    tail = n - n_main

    if tail == 0:
        out_flat = _mish_2d(
            x_flat.reshape(n_main // LANE, LANE),
            tile_bytes=tile_bytes, donate=donate).reshape(-1)
    elif n_main == 0:
        # Whole array is smaller than one 128-lane row.
        out_flat = _mish_tiny(x_flat)
    else:
        # Ragged: kernel on the 128-aligned prefix; the <128-element tail is
        # computed with plain jnp (fused by XLA into the concat) instead of a
        # full-array pad + slice pass.
        head = _mish_2d(
            x_flat[:n_main].reshape(n_main // LANE, LANE),
            tile_bytes=tile_bytes, donate=False).reshape(-1)
        xt = x_flat[n_main:].astype(jnp.float32)
        tail_out = (xt * jnp.tanh(jax.nn.softplus(xt))).astype(x.dtype)
        out_flat = jnp.concatenate([head, tail_out])

    return out_flat.reshape(orig_shape)


if __name__ == "__main__":
    def ref_mish(v):
        vf = v.astype(jnp.float32)
        return (vf * jnp.tanh(jax.nn.softplus(vf))).astype(v.dtype)

    key = jax.random.PRNGKey(0)

    # Shape implied by the module's usage (NCHW activation map).
    x = jax.random.normal(key, (2, 4, 16, 16), dtype=jnp.float32)
    y = mish(x)
    jax.block_until_ready(y)
    assert y.shape == x.shape and y.dtype == x.dtype
    assert jnp.allclose(y, ref_mish(x), atol=1e-5, rtol=1e-5)

    # Wide-range check (+/-30): validates the exp(-|x|) rational rewrite and
    # the approx-reciprocal + Newton-Raphson path at f32 tolerance.
    xw = jnp.linspace(-30.0, 30.0, 8 * 1024, dtype=jnp.float32).reshape(8, 1024)
    yw = mish(xw)
    jax.block_until_ready(yw)
    assert jnp.allclose(yw, ref_mish(xw), atol=2e-5, rtol=2e-5)

    # Multi-step grid + ragged trailing row-block (small tile override).
    xg = jax.random.normal(jax.random.PRNGKey(2), (2, 3, 40, 128), dtype=jnp.float32)
    yg = mish(xg, tile_bytes=64 * 1024)
    jax.block_until_ready(yg)
    assert jnp.allclose(yg, ref_mish(xg), atol=1e-5, rtol=1e-5)

    # bf16 exercises the approx-reciprocal (no Newton step) output path.
    xb = jax.random.normal(jax.random.PRNGKey(3), (2, 4, 16, 16), dtype=jnp.bfloat16)
    yb = mish(xb)
    jax.block_until_ready(yb)
    assert yb.dtype == xb.dtype
    assert jnp.allclose(yb.astype(jnp.float32),
                        ref_mish(xb.astype(jnp.float32)),
                        atol=2e-2, rtol=2e-2)

    # Ragged sizes: tiny single-block path (105 elems) and aligned-prefix +
    # jnp-tail path (273 = 2*128 + 17 elems).
    xr = jax.random.normal(jax.random.PRNGKey(1), (3, 5, 7), dtype=jnp.float32)
    yr = mish(xr)
    jax.block_until_ready(yr)
    assert yr.shape == xr.shape
    assert jnp.allclose(yr, ref_mish(xr), atol=1e-5, rtol=1e-5)

    xr2 = jax.random.normal(jax.random.PRNGKey(4), (3, 7, 13), dtype=jnp.float32)
    yr2 = mish(xr2)
    jax.block_until_ready(yr2)
    assert jnp.allclose(yr2, ref_mish(xr2), atol=1e-5, rtol=1e-5)

    print("KERNEL_OK")
</pallas_src>

<mosaic_0001>
module attributes {stable_mosaic.version = 11 : i64} {
  func.func @_mish_kernel(%arg0: i32, %arg1: memref<16x128xf32, #tpu.memory_space<vmem>>, %arg2: memref<16x128xf32, #tpu.memory_space<vmem>>) attributes {dimension_semantics = [#tpu.dimension_semantics<parallel>], iteration_bounds = array<i64: 1>, scalar_prefetch = 0 : i64, scratch_operands = 0 : i64, tpu.core_type = #tpu.core_type<tc>, window_params = [{transform_indices = @transform_0, window_bounds = array<i64: 16, 128>}, {transform_indices = @transform_1, window_bounds = array<i64: 16, 128>}]} {
    %c0 = arith.constant 0 : index
    %c0_0 = arith.constant 0 : index
    %0 = vector.load %arg1[%c0, %c0_0] : memref<16x128xf32, #tpu.memory_space<vmem>>, vector<16x128xf32>
    %1 = math.absf %0 : vector<16x128xf32>
    %cst = arith.constant 0.000000e+00 : f32
    %2 = vector.broadcast %cst : f32 to vector<16x128xf32>
    %3 = arith.subf %2, %1 : vector<16x128xf32>
    %4 = math.exp %3 : vector<16x128xf32>
    %cst_1 = arith.constant 0.000000e+00 : f32
    %5 = vector.broadcast %cst_1 : f32 to vector<16x128xf32>
    %6 = arith.cmpf oge, %0, %5 : vector<16x128xf32>
    %cst_2 = arith.constant 1.000000e+00 : f32
    %7 = vector.broadcast %cst_2 : f32 to vector<16x128xf32>
    %8 = arith.select %6, %7, %4 : vector<16x128xi1>, vector<16x128xf32>
    %cst_3 = arith.constant 1.000000e+00 : f32
    %9 = vector.broadcast %cst_3 : f32 to vector<16x128xf32>
    %10 = arith.select %6, %4, %9 : vector<16x128xi1>, vector<16x128xf32>
    %cst_4 = arith.constant 2.000000e+00 : f32
    %11 = vector.broadcast %cst_4 : f32 to vector<16x128xf32>
    %12 = arith.mulf %11, %10 : vector<16x128xf32>
    %13 = arith.addf %8, %12 : vector<16x128xf32>
    %14 = arith.mulf %8, %13 : vector<16x128xf32>
    %15 = arith.mulf %10, %10 : vector<16x128xf32>
    %cst_5 = arith.constant 2.000000e+00 : f32
    %16 = vector.broadcast %cst_5 : f32 to vector<16x128xf32>
    %17 = arith.mulf %16, %15 : vector<16x128xf32>
    %18 = arith.addf %14, %17 : vector<16x128xf32>
    %19 = tpu.reciprocal %18 {approx = true} : vector<16x128xf32> -> vector<16x128xf32>
    %20 = arith.mulf %18, %19 : vector<16x128xf32>
    %cst_6 = arith.constant 2.000000e+00 : f32
    %21 = vector.broadcast %cst_6 : f32 to vector<16x128xf32>
    %22 = arith.subf %21, %20 : vector<16x128xf32>
    %23 = arith.mulf %19, %22 : vector<16x128xf32>
    %24 = arith.mulf %0, %14 : vector<16x128xf32>
    %25 = arith.mulf %24, %23 : vector<16x128xf32>
    %c0_7 = arith.constant 0 : index
    %c0_8 = arith.constant 0 : index
    %26 = vector.load %arg2[%c0_7, %c0_8] : memref<16x128xf32, #tpu.memory_space<vmem>>, vector<16x128xf32>
    tpu.vector_store %arg2[%c0_7, %c0_8], %25 {strides = array<i32>} : memref<16x128xf32, #tpu.memory_space<vmem>>, vector<16x128xf32>,
    return
  }
  func.func @transform_0(%arg0: i32) -> (i32, i32) {
    %c0_i32 = arith.constant 0 : i32
    %c0_i32_0 = arith.constant 0 : i32
    return %arg0, %c0_i32 : i32, i32
  }
  func.func @transform_1(%arg0: i32) -> (i32, i32) {
    %c0_i32 = arith.constant 0 : i32
    %c0_i32_0 = arith.constant 0 : i32
    return %arg0, %c0_i32 : i32, i32
  }
}

</mosaic_0001>

<bundles_post_ra>
// kernel: tpu_custom_call.1
= control target key start
LH: loop header
LB: loop body
LE: loop exit
PB: predicated region body
PF: predicated region fallthrough
CT: control target
= control target key end

     0   :  { %6 = vsyncpa [#allocation3], 0  ;;  %s164_s0 = inlined_call_operand.hbm [shape: f32[16,128], index: 0, kind: input, shape index: {}]   ;;  %s165_s1 = inlined_call_operand.hbm [shape: f32[16,128], index: 1, kind: output, shape index: {}]  }
   0x1   :  { %7 = vsyncpa [#allocation4], 0  ;;  %s138_s6 = smov [#allocation2]  }
   0x2   :  { %s13_s7 = sshll.u32 %s138_s6, 4  ;;  %s14_s7 = int_to_ptr.vmem [resolvable:$true] %s13_s7 }
   0x3   :  { %s102_s8 = scalar_lea.vmem %s14_s7, 256  ;;  %p107_p1 = scmp.lt.s32.totalorder %s14_s7, %s14_s7 }
   0x4   :  { %p103_p0 = scmp.ne.s32.totalorder %s14_s7, %s102_s8  ;;  %p108_p2 = scmp.lt.s32.totalorder %s102_s8, %s102_s8 }
   0x6   :  { %p109_p3 = por %p108_p2, %p107_p1 }
   0x8   :  { %p110_p4 = pnand %p109_p3, %p103_p0 }
   0xa   :  { %113 = shalt.err (!%p110_p4)
}
   0xb   :  { %s139_s9 = smov 128   ;;  %s140_s10 = smov 8  }
   0xc   :  { %19 = dma.hbm_to_vmem [thread:$0]  %s164_s0, 256, %s14_s7, [#allocation3], %s139_s9, %s139_s9, %s140_s10  }
   0xd   :  { %134 = dma.done.wait [#allocation3], 256  }
   0xe   :  { %135 = vsyncadd [#allocation3], 4294967040  ;;  %v23_v0 = vld [vmem:[#allocation2] sm:$0xff]  ;;  %v24_v1 = vld [vmem:[#allocation2 + $0x8] sm:$0xff]  ;;  %s141_s0 = smov [#allocation5]  }
   0xf   :  { %v25_v2 = vand.u32 2147483647, %v23_v0  ;;  %v26_v3 = vand.u32 2147483647, %v24_v1  ;;  %vm33_vm0 = vcmp.ge.f32.partialorder %v23_v0, 0.0  ;;  %vm34_vm1 = vcmp.ge.f32.partialorder %v24_v1, 0.0 }
  0x10   :  { %s70_s13 = sshll.u32 %s141_s0, 4  ;;  %s71_s13 = int_to_ptr.vmem [resolvable:$true] %s70_s13 }
  0x11   :  { %v27_v4 = vsub.f32 0.0, %v25_v2  ;;  %v28_v5 = vsub.f32 0.0, %v26_v3  ;;  %s114_s14 = scalar_lea.vmem %s71_s13, 256  ;;  %p119_p6 = scmp.lt.s32.totalorder %s71_s13, %s71_s13 }
  0x12   :  { %p115_p5 = scmp.ne.s32.totalorder %s71_s13, %s114_s14  ;;  %p120_p7 = scmp.lt.s32.totalorder %s114_s14, %s114_s14 }
  0x13   :  { %v29_v6 = vmul.f32 1.442695, %v27_v4  ;;  %v31_v7 = vmul.f32 1.442695, %v28_v5 }
  0x14   :  { %p121_p8 = por %p120_p7, %p119_p6 }
  0x15   :  { %86 = vpow2.f32 %v29_v6 }
  0x16   :  { %88 = vpow2.f32 %v31_v7  ;;  %p122_p9 = pnand %p121_p8, %p115_p5 }
  0x22   :  { %v87_v8 = vpop.eup %86 }
  0x23   :  { %v89_v9 = vpop.eup %88  ;;  %v35_v10 = vsel %vm33_vm0, 1.0, %v87_v8  ;;  %v37_v11 = vsel %vm33_vm0, %v87_v8, 1.0 }
  0x24   :  { %v39_v12 = vmul.f32 2.0, %v37_v11  ;;  %v45_v13 = vmul.f32 %v37_v11, %v37_v11  ;;  %v36_v14 = vsel %vm34_vm1, 1.0, %v89_v9  ;;  %v38_v15 = vsel %vm34_vm1, %v89_v9, 1.0 }
  0x25   :  { %v40_v16 = vmul.f32 2.0, %v38_v15  ;;  %v46_v17 = vmul.f32 %v38_v15, %v38_v15 }
  0x26   :  { %v41_v18 = vadd.f32 %v39_v12, %v35_v10  ;;  %v47_v19 = vmul.f32 2.0, %v45_v13 }
  0x27   :  { %v42_v20 = vadd.f32 %v40_v16, %v36_v14  ;;  %v48_v21 = vmul.f32 2.0, %v46_v17 }
  0x28   :  { %v43_v22 = vmul.f32 %v41_v18, %v35_v10 }
  0x29   :  { %v44_v23 = vmul.f32 %v42_v20, %v36_v14 }
  0x2a   :  { %v49_v24 = vadd.f32 %v47_v19, %v43_v22  ;;  %v59_v31 = vmul.f32 %v43_v22, %v23_v0 }
  0x2b   :  { %v50_v25 = vadd.f32 %v48_v21, %v44_v23  ;;  %v60_v33 = vmul.f32 %v44_v23, %v24_v1 }
  0x2c   :  { %90 = vrcp.f32 %v49_v24 }
  0x2d   :  { %92 = vrcp.f32 %v50_v25 }
  0x39   :  { %v91_v26 = vpop.eup %90 }
  0x3a   :  { %v93_v27 = vpop.eup %92  ;;  %v53_v28 = vmul.f32 %v91_v26, %v49_v24 }
  0x3b   :  { %v54_v29 = vmul.f32 %v93_v27, %v50_v25 }
  0x3c   :  { %v55_v30 = vsub.f32 2.0, %v53_v28 }
  0x3d   :  { %v56_v32 = vsub.f32 2.0, %v54_v29 }
  0x3e   :  { %v57_v34 = vmul.f32 %v91_v26, %v55_v30 }
  0x3f   :  { %v58_v35 = vmul.f32 %v93_v27, %v56_v32 }
  0x40   :  { %v61_v36 = vmul.f32 %v59_v31, %v57_v34 }
  0x41   :  { %v62_v37 = vmul.f32 %v60_v33, %v58_v35 }
  0x42   :  { %63 = vst [vmem:[#allocation5] sm:$0xff] %v61_v36 }
  0x43   :  { %64 = vst [vmem:[#allocation5 + $0x8] sm:$0xff] %v62_v37 }
  0x44   :  { %125 = shalt.err (!%p122_p9)
}
  0x45   :  { %76 = dma.vmem_to_hbm [thread:$0]  %s71_s13, 256, %s165_s1, [#allocation4], %s139_s9, %s139_s9, %s140_s10  }
  0x46   :  { %136 = dma.done.wait [#allocation4], 256  }
  0x47   :  { %137 = vsyncadd [#allocation4], 4294967040 }
  0x48   :  { %80 = vsyncpa [#allocation3], 1 }
  0x49   :  { %81 = vsyncpa [#allocation4], 1 }

</bundles_post_ra>
